<compile_context>
chip_gen: v7x
topology: tpu7x:2x2x1
jax: 0.10.0
libtpu: 0.0.40
codegen_flags: <defaults>
</compile_context>

<pallas_src>
import functools

import jax
import jax.numpy as jnp
from jax import lax
from jax.experimental import pallas as pl
from jax.experimental.pallas import tpu as pltpu


def _round_up(a, b):
    return (a + b - 1) // b * b


def _cdiv(a, b):
    return -(-a // b)


def _mlp_embed_kernel(*refs, embed_size, eps, out_fn, has_noise):
    if has_noise:
        (x_ref, noise_ref, colmod_ref,
         w1e_ref, b1e_ref, w2_ref, b2_ref, w3_ref, b3_ref,
         g1_ref, bt1_ref, g2_ref, bt2_ref,
         out_ref, logits_ref) = refs
    else:
        (x_ref, colmod_ref,
         w1e_ref, b1e_ref, w2_ref, b2_ref, w3_ref, b3_ref,
         g1_ref, bt1_ref, g2_ref, bt2_ref,
         out_ref, logits_ref) = refs
        noise_ref = None

    x = x_ref[...]                                   # already bf16 (wrapper cast)

    # Fused fc1 + embedding projection:
    #   z = x @ [we_pad | w1] + [be_pad | b1]   -> (TB, EP + H)
    z = jnp.dot(x, w1e_ref[...], preferred_element_type=jnp.float32) + b1e_ref[...]
    ep = logits_ref.shape[-1]                        # padded embed width (128k)
    logits_pad = z[:, :ep]                           # lane-aligned slice, pad cols = 0
    ppa1 = z[:, ep:]                                 # (TB, H), lane-aligned start

    logits_ref[...] = logits_pad                     # lane-dense store

    # Hard one-hot selection index.  Gumbel noise only streamed when exploring.
    if has_noise:
        y = logits_pad + noise_ref[...]
    else:
        y = logits_pad
    col = lax.broadcasted_iota(jnp.int32, y.shape, 1)
    y = jnp.where(col < embed_size, y, -jnp.inf)     # mask padded columns
    row_max = jnp.max(y, axis=-1, keepdims=True)
    idx = jnp.min(jnp.where(y == row_max, col, ep), axis=-1, keepdims=True)

    # emb.repeat(1, H // E) gating: keep column c iff (c % E) == idx.
    # (c % E) is precomputed host-side as a resident (1, H) int32 table.
    pa1 = jnp.where(colmod_ref[...] == idx, ppa1, 0.0)

    def layer_norm(v, gamma, beta):
        mu = jnp.mean(v, axis=-1, keepdims=True)
        d = v - mu
        var = jnp.mean(d * d, axis=-1, keepdims=True)   # two-pass (stable)
        return d * lax.rsqrt(var + eps) * gamma + beta

    h1 = jax.nn.relu(layer_norm(pa1, g1_ref[...], bt1_ref[...]))

    z2 = jnp.dot(h1.astype(jnp.bfloat16), w2_ref[...],
                 preferred_element_type=jnp.float32) + b2_ref[...]
    h2 = jax.nn.relu(layer_norm(z2, g2_ref[...], bt2_ref[...]))

    o = jnp.dot(h2.astype(jnp.bfloat16), w3_ref[...],
                preferred_element_type=jnp.float32) + b3_ref[...]

    if out_fn == 'tanh':
        o = jnp.tanh(o)
    elif out_fn == 'relu':
        o = jax.nn.relu(o)
    # 'linear': identity

    out_ref[...] = o                                  # lane-dense store


def prepare_params(params, *, lane=128):
    """Fuse/pad/cast params once (outside the kernel & outside the hot path)."""
    H = params['w1'].shape[1]
    E = params['we'].shape[1]
    O = params['w3'].shape[1]
    EP = _round_up(E, lane)
    OP = _round_up(O, lane)

    we_p = jnp.pad(params['we'], ((0, 0), (0, EP - E)))
    be_p = jnp.pad(params['be'], ((0, 0), (0, EP - E)))
    # embedding block first so both in-kernel slices are lane-aligned
    w1e = jnp.concatenate([we_p, params['w1']], axis=1).astype(jnp.bfloat16)
    b1e = jnp.concatenate([be_p, params['b1']], axis=1).astype(jnp.float32)

    w3p = jnp.pad(params['w3'], ((0, 0), (0, OP - O))).astype(jnp.bfloat16)
    b3p = jnp.pad(params['b3'], ((0, 0), (0, OP - O))).astype(jnp.float32)

    col_mod = (jnp.arange(H, dtype=jnp.int32) % E)[None, :]   # (1, H) gating table

    return dict(
        w1e=w1e, b1e=b1e,
        w2=params['w2'].astype(jnp.bfloat16), b2=params['b2'].astype(jnp.float32),
        w3=w3p, b3=b3p,
        g1=params['g1'], bt1=params['bt1'],
        g2=params['g2'], bt2=params['bt2'],
        col_mod=col_mod,
    )


def _vmem_cap_bytes():
    """~3/4 of physical per-core VMEM; conservative 48 MiB if the query fails."""
    cap = 48 << 20                       # safe on v7x (64 MiB/TC physical)
    try:
        cap = max(cap, int(pltpu.get_tpu_info().vmem_capacity_bytes) * 3 // 4)
    except Exception:
        pass
    return cap


def mlp_with_embedding_forward(prep, x, *, embed_size, out_dim, key=None,
                               explore_emb=True, out_fn='tanh', eps=1e-5,
                               block_b=512, stream_buffers=2):
    """Full forward pass in one batch-tiled Pallas kernel.

    Returns (out[batch, out_dim], embed_logits[batch, embed_size])."""
    batch, input_dim = x.shape
    hidden_dim = prep['w2'].shape[0]
    EP = prep['b1e'].shape[1] - hidden_dim       # padded embedding width
    OP = prep['b3'].shape[1]                     # padded output width
    assert hidden_dim % embed_size == 0

    # Balanced batch tiling: minimize padded rows; >=2 tiles when there is
    # enough work so ("parallel",) can use both v7x TensorCores.
    min_tiles = 2 if batch >= 16 else 1
    nb = max(min_tiles, _cdiv(batch, block_b))
    TB = _round_up(_cdiv(batch, nb), 8)          # f32/bf16 sublane multiple
    nb = _cdiv(batch, TB)
    Bpad = nb * TB

    xp = x.astype(jnp.bfloat16)                  # pre-cast: halves x HBM/VMEM
    if Bpad != batch:
        xp = jnp.pad(xp, ((0, Bpad - batch), (0, 0)))

    kernel = functools.partial(_mlp_embed_kernel, embed_size=embed_size,
                               eps=eps, out_fn=out_fn, has_noise=explore_emb)

    def tiled(last):
        if stream_buffers == 2:
            return pl.BlockSpec((TB, last), lambda i: (i, 0))
        return pl.BlockSpec((TB, last), lambda i: (i, 0),
                            pipeline_mode=pl.Buffered(stream_buffers))

    def resident(arr):
        # Constant index_map -> a second pipeline buffer is pure VMEM waste.
        return pl.BlockSpec(arr.shape, lambda i: (0, 0),
                            pipeline_mode=pl.Buffered(1))

    resident_keys = ('col_mod', 'w1e', 'b1e', 'w2', 'b2', 'w3', 'b3',
                     'g1', 'bt1', 'g2', 'bt2')

    in_specs = [tiled(input_dim)]
    args = [xp]
    if explore_emb:
        assert key is not None, "explore_emb=True needs a PRNG key"
        noise = jax.random.gumbel(key, (Bpad, EP), jnp.float32)
        in_specs.append(tiled(EP))
        args.append(noise)
    in_specs += [resident(prep[k]) for k in resident_keys]
    args += [prep[k] for k in resident_keys]

    out_specs = (pl.BlockSpec((TB, OP), lambda i: (i, 0)),
                 pl.BlockSpec((TB, EP), lambda i: (i, 0)))

    # VMEM budget: resident params (x1) + double-buffered streamed tiles,
    # x2 + 16 MiB headroom for intermediates, capped per generation.
    resident_bytes = sum(int(prep[k].size) * prep[k].dtype.itemsize
                         for k in resident_keys)
    stream_bytes = TB * (input_dim * 2 + OP * 4 + EP * 4)
    if explore_emb:
        stream_bytes += TB * EP * 4
    needed = resident_bytes + 2 * stream_bytes
    vmem_limit = int(min(_vmem_cap_bytes(), max(2 * needed + (16 << 20), 32 << 20)))

    out_p, logits_p = pl.pallas_call(
        kernel,
        grid=(nb,),
        out_shape=(
            jax.ShapeDtypeStruct((Bpad, OP), jnp.float32),
            jax.ShapeDtypeStruct((Bpad, EP), jnp.float32),
        ),
        in_specs=in_specs,
        out_specs=out_specs,
        compiler_params=pltpu.CompilerParams(
            dimension_semantics=("parallel",),
            vmem_limit_bytes=vmem_limit),
    )(*args)

    return out_p[:batch, :out_dim], logits_p[:batch, :embed_size]


def init_params(key, input_dim, hidden_dim, out_dim, embed_size, out_fn='tanh'):
    """Deterministic synthetic init mirroring nn.Linear / nn.LayerNorm shapes
    (weights stored pre-transposed as (in_features, out_features))."""
    ks = jax.random.split(key, 5)

    def linear_init(k, fan_in, fan_out):
        bound = 1.0 / (fan_in ** 0.5)
        kw, kb = jax.random.split(k)
        w = jax.random.uniform(kw, (fan_in, fan_out), jnp.float32, -bound, bound)
        b = jax.random.uniform(kb, (1, fan_out), jnp.float32, -bound, bound)
        return w, b

    w1, b1 = linear_init(ks[0], input_dim, hidden_dim)
    we, be = linear_init(ks[1], input_dim, embed_size)
    w2, b2 = linear_init(ks[2], hidden_dim, hidden_dim)
    w3, b3 = linear_init(ks[3], hidden_dim, out_dim)
    if out_fn == 'tanh':
        # module does fc3.weight.data.uniform_(-0.003, 0.003)
        w3 = jax.random.uniform(ks[4], (hidden_dim, out_dim), jnp.float32,
                                -0.003, 0.003)
    return dict(
        w1=w1, b1=b1, we=we, be=be, w2=w2, b2=b2, w3=w3, b3=b3,
        g1=jnp.ones((1, hidden_dim), jnp.float32),
        bt1=jnp.zeros((1, hidden_dim), jnp.float32),
        g2=jnp.ones((1, hidden_dim), jnp.float32),
        bt2=jnp.zeros((1, hidden_dim), jnp.float32),
    )


def _reference_forward(params, x, onehot_idx, *, out_fn='tanh', eps=1e-5):
    """Pure-JAX f32 reference of the deterministic path, given the chosen index."""
    H = params['w1'].shape[1]
    E = params['we'].shape[1]
    ppa1 = x @ params['w1'] + params['b1']
    onehot = jax.nn.one_hot(onehot_idx, E, dtype=jnp.float32)
    pa1 = ppa1 * jnp.tile(onehot, (1, H // E))

    def ln(v, g, b):
        mu = v.mean(-1, keepdims=True)
        var = ((v - mu) ** 2).mean(-1, keepdims=True)
        return (v - mu) / jnp.sqrt(var + eps) * g + b

    h1 = jax.nn.relu(ln(pa1, params['g1'], params['bt1']))
    h2 = jax.nn.relu(ln(h1 @ params['w2'] + params['b2'],
                        params['g2'], params['bt2']))
    o = h2 @ params['w3'] + params['b3']
    if out_fn == 'tanh':
        o = jnp.tanh(o)
    elif out_fn == 'relu':
        o = jax.nn.relu(o)
    return o


if __name__ == "__main__":
    key = jax.random.PRNGKey(0)
    k_param, k_x, k_noise, k_x2 = jax.random.split(key, 4)

    batch, input_dim, hidden_dim, embed_size, out_dim = 8, 16, 32, 8, 4
    params = init_params(k_param, input_dim, hidden_dim, out_dim, embed_size,
                         out_fn='tanh')
    prep = prepare_params(params)
    x = jax.random.normal(k_x, (batch, input_dim), jnp.float32)

    # explore_emb=True path (gumbel-softmax hard, host-side Gumbel noise)
    out, logits = mlp_with_embedding_forward(
        prep, x, embed_size=embed_size, out_dim=out_dim, key=k_noise,
        explore_emb=True, out_fn='tanh')
    jax.block_until_ready((out, logits))
    assert out.shape == (batch, out_dim) and logits.shape == (batch, embed_size)
    assert bool(jnp.all(jnp.isfinite(out))) and bool(jnp.all(jnp.abs(out) <= 1.0 + 1e-6))

    # explore_emb=False path (deterministic onehot-from-logits) + reference check
    out2, logits2 = mlp_with_embedding_forward(
        prep, x, embed_size=embed_size, out_dim=out_dim,
        explore_emb=False, out_fn='tanh')
    jax.block_until_ready((out2, logits2))

    ref_logits = x @ params['we'] + params['be']
    assert bool(jnp.allclose(logits2, ref_logits, atol=2e-2, rtol=2e-2))
    idx = jnp.argmax(logits2, axis=-1)
    ref_out = _reference_forward(params, x, idx, out_fn='tanh')
    assert bool(jnp.allclose(out2, ref_out, atol=2e-2, rtol=2e-2))

    # Non-multiple-of-8 batch exercises the balanced-tile / row-padding path.
    x3 = jax.random.normal(k_x2, (10, input_dim), jnp.float32)
    out3, logits3 = mlp_with_embedding_forward(
        prep, x3, embed_size=embed_size, out_dim=out_dim,
        explore_emb=False, out_fn='tanh')
    jax.block_until_ready((out3, logits3))
    ref_logits3 = x3 @ params['we'] + params['be']
    assert bool(jnp.allclose(logits3, ref_logits3, atol=2e-2, rtol=2e-2))
    idx3 = jnp.argmax(logits3, axis=-1)
    ref_out3 = _reference_forward(params, x3, idx3, out_fn='tanh')
    assert bool(jnp.allclose(out3, ref_out3, atol=2e-2, rtol=2e-2))

    print("KERNEL_OK")
</pallas_src>

<mosaic_0001>
module attributes {stable_mosaic.version = 11 : i64} {
  func.func @_mlp_embed_kernel(%arg0: i32, %arg1: memref<8x16xbf16, #tpu.memory_space<vmem>>, %arg2: memref<8x128xf32, #tpu.memory_space<vmem>>, %arg3: memref<1x32xi32, #tpu.memory_space<vmem>>, %arg4: memref<16x160xbf16, #tpu.memory_space<vmem>>, %arg5: memref<1x160xf32, #tpu.memory_space<vmem>>, %arg6: memref<32x32xbf16, #tpu.memory_space<vmem>>, %arg7: memref<1x32xf32, #tpu.memory_space<vmem>>, %arg8: memref<32x128xbf16, #tpu.memory_space<vmem>>, %arg9: memref<1x128xf32, #tpu.memory_space<vmem>>, %arg10: memref<1x32xf32, #tpu.memory_space<vmem>>, %arg11: memref<1x32xf32, #tpu.memory_space<vmem>>, %arg12: memref<1x32xf32, #tpu.memory_space<vmem>>, %arg13: memref<1x32xf32, #tpu.memory_space<vmem>>, %arg14: memref<8x128xf32, #tpu.memory_space<vmem>>, %arg15: memref<8x128xf32, #tpu.memory_space<vmem>>) attributes {dimension_semantics = [#tpu.dimension_semantics<parallel>], iteration_bounds = array<i64: 1>, scalar_prefetch = 0 : i64, scratch_operands = 0 : i64, tpu.core_type = #tpu.core_type<tc>, window_params = [{transform_indices = @transform_0, window_bounds = array<i64: 8, 16>}, {transform_indices = @transform_1, window_bounds = array<i64: 8, 128>}, {pipeline_mode = #tpu.pipeline_mode<synchronous>, transform_indices = @transform_2, window_bounds = array<i64: 1, 32>}, {pipeline_mode = #tpu.pipeline_mode<synchronous>, transform_indices = @transform_3, window_bounds = array<i64: 16, 160>}, {pipeline_mode = #tpu.pipeline_mode<synchronous>, transform_indices = @transform_4, window_bounds = array<i64: 1, 160>}, {pipeline_mode = #tpu.pipeline_mode<synchronous>, transform_indices = @transform_5, window_bounds = array<i64: 32, 32>}, {pipeline_mode = #tpu.pipeline_mode<synchronous>, transform_indices = @transform_6, window_bounds = array<i64: 1, 32>}, {pipeline_mode = #tpu.pipeline_mode<synchronous>, transform_indices = @transform_7, window_bounds = array<i64: 32, 128>}, {pipeline_mode = #tpu.pipeline_mode<synchronous>, transform_indices = @transform_8, window_bounds = array<i64: 1, 128>}, {pipeline_mode = #tpu.pipeline_mode<synchronous>, transform_indices = @transform_9, window_bounds = array<i64: 1, 32>}, {pipeline_mode = #tpu.pipeline_mode<synchronous>, transform_indices = @transform_10, window_bounds = array<i64: 1, 32>}, {pipeline_mode = #tpu.pipeline_mode<synchronous>, transform_indices = @transform_11, window_bounds = array<i64: 1, 32>}, {pipeline_mode = #tpu.pipeline_mode<synchronous>, transform_indices = @transform_12, window_bounds = array<i64: 1, 32>}, {transform_indices = @transform_13, window_bounds = array<i64: 8, 128>}, {transform_indices = @transform_14, window_bounds = array<i64: 8, 128>}]} {
    %c0 = arith.constant 0 : index
    %c0_0 = arith.constant 0 : index
    %0 = vector.load %arg1[%c0, %c0_0] : memref<8x16xbf16, #tpu.memory_space<vmem>>, vector<8x16xbf16>
    %c0_1 = arith.constant 0 : index
    %c0_2 = arith.constant 0 : index
    %1 = vector.load %arg4[%c0_1, %c0_2] : memref<16x160xbf16, #tpu.memory_space<vmem>>, vector<16x160xbf16>
    %cst = arith.constant dense<0.000000e+00> : vector<8x160xf32>
    %2 = tpu.matmul %0, %1, %cst {dimension_numbers = #tpu.dot_dimension_numbers<[1], [0], [0], [1], [0, 0, 1, 1], [], []>} : vector<8x16xbf16>, vector<16x160xbf16>, vector<8x160xf32> -> vector<8x160xf32>
    %c0_3 = arith.constant 0 : index
    %c0_4 = arith.constant 0 : index
    %3 = vector.load %arg5[%c0_3, %c0_4] : memref<1x160xf32, #tpu.memory_space<vmem>>, vector<1x160xf32>
    %4 = vector.broadcast %3 : vector<1x160xf32> to vector<8x160xf32>
    %5 = arith.addf %2, %4 : vector<8x160xf32>
    %6 = vector.extract_strided_slice %5 {offsets = [0, 0], sizes = [8, 128], strides = [1, 1]} : vector<8x160xf32> to vector<8x128xf32>
    %7 = vector.extract_strided_slice %5 {offsets = [0, 128], sizes = [8, 32], strides = [1, 1]} : vector<8x160xf32> to vector<8x32xf32>
    %c0_5 = arith.constant 0 : index
    %c0_6 = arith.constant 0 : index
    %8 = vector.load %arg15[%c0_5, %c0_6] : memref<8x128xf32, #tpu.memory_space<vmem>>, vector<8x128xf32>
    tpu.vector_store %arg15[%c0_5, %c0_6], %6 {strides = array<i32>} : memref<8x128xf32, #tpu.memory_space<vmem>>, vector<8x128xf32>,
    %c0_7 = arith.constant 0 : index
    %c0_8 = arith.constant 0 : index
    %9 = vector.load %arg2[%c0_7, %c0_8] : memref<8x128xf32, #tpu.memory_space<vmem>>, vector<8x128xf32>
    %10 = arith.addf %6, %9 : vector<8x128xf32>
    %11 = tpu.iota {dimensions = array<i32: 1>} : vector<8x128xi32>
    %c8_i32 = arith.constant 8 : i32
    %12 = vector.broadcast %c8_i32 : i32 to vector<8x128xi32>
    %13 = arith.cmpi slt, %11, %12 : vector<8x128xi32>
    %cst_9 = arith.constant 0xFF800000 : f32
    %14 = vector.broadcast %cst_9 : f32 to vector<8x128xf32>
    %15 = arith.select %13, %10, %14 : vector<8x128xi1>, vector<8x128xf32>
    %cst_10 = arith.constant dense<0xFF800000> : vector<8xf32>
    %16 = vector.multi_reduction <maximumf>, %15, %cst_10 [1] : vector<8x128xf32> to vector<8xf32>
    %17 = vector.shape_cast %16 : vector<8xf32> to vector<8x1xf32>
    %18 = vector.broadcast %17 : vector<8x1xf32> to vector<8x128xf32>
    %19 = arith.cmpf oeq, %15, %18 : vector<8x128xf32>
    %c128_i32 = arith.constant 128 : i32
    %20 = vector.broadcast %c128_i32 : i32 to vector<8x128xi32>
    %21 = arith.select %19, %11, %20 : vector<8x128xi1>, vector<8x128xi32>
    %cst_11 = arith.constant dense<2147483647> : vector<8xi32>
    %22 = vector.multi_reduction <minsi>, %21, %cst_11 [1] : vector<8x128xi32> to vector<8xi32>
    %23 = vector.shape_cast %22 : vector<8xi32> to vector<8x1xi32>
    %c0_12 = arith.constant 0 : index
    %c0_13 = arith.constant 0 : index
    %24 = vector.load %arg3[%c0_12, %c0_13] : memref<1x32xi32, #tpu.memory_space<vmem>>, vector<1x32xi32>
    %25 = vector.broadcast %24 : vector<1x32xi32> to vector<8x32xi32>
    %26 = vector.broadcast %23 : vector<8x1xi32> to vector<8x32xi32>
    %27 = arith.cmpi eq, %25, %26 : vector<8x32xi32>
    %cst_14 = arith.constant 0.000000e+00 : f32
    %28 = vector.broadcast %cst_14 : f32 to vector<8x32xf32>
    %29 = arith.select %27, %7, %28 : vector<8x32xi1>, vector<8x32xf32>
    %c0_15 = arith.constant 0 : index
    %c0_16 = arith.constant 0 : index
    %30 = vector.load %arg10[%c0_15, %c0_16] : memref<1x32xf32, #tpu.memory_space<vmem>>, vector<1x32xf32>
    %c0_17 = arith.constant 0 : index
    %c0_18 = arith.constant 0 : index
    %31 = vector.load %arg11[%c0_17, %c0_18] : memref<1x32xf32, #tpu.memory_space<vmem>>, vector<1x32xf32>
    %cst_19 = arith.constant dense<0.000000e+00> : vector<8xf32>
    %32 = vector.multi_reduction <add>, %29, %cst_19 [1] : vector<8x32xf32> to vector<8xf32>
    %33 = vector.shape_cast %32 : vector<8xf32> to vector<8x1xf32>
    %cst_20 = arith.constant 3.200000e+01 : f32
    %34 = vector.broadcast %cst_20 : f32 to vector<8x1xf32>
    %35 = arith.divf %33, %34 : vector<8x1xf32>
    %36 = vector.broadcast %35 : vector<8x1xf32> to vector<8x32xf32>
    %37 = arith.subf %29, %36 : vector<8x32xf32>
    %38 = arith.mulf %37, %37 : vector<8x32xf32>
    %cst_21 = arith.constant dense<0.000000e+00> : vector<8xf32>
    %39 = vector.multi_reduction <add>, %38, %cst_21 [1] : vector<8x32xf32> to vector<8xf32>
    %40 = vector.shape_cast %39 : vector<8xf32> to vector<8x1xf32>
    %cst_22 = arith.constant 3.200000e+01 : f32
    %41 = vector.broadcast %cst_22 : f32 to vector<8x1xf32>
    %42 = arith.divf %40, %41 : vector<8x1xf32>
    %cst_23 = arith.constant 9.99999974E-6 : f32
    %43 = vector.broadcast %cst_23 : f32 to vector<8x1xf32>
    %44 = arith.addf %42, %43 : vector<8x1xf32>
    %45 = math.rsqrt %44 : vector<8x1xf32>
    %46 = vector.broadcast %45 : vector<8x1xf32> to vector<8x32xf32>
    %47 = arith.mulf %37, %46 : vector<8x32xf32>
    %48 = vector.broadcast %30 : vector<1x32xf32> to vector<8x32xf32>
    %49 = arith.mulf %47, %48 : vector<8x32xf32>
    %50 = vector.broadcast %31 : vector<1x32xf32> to vector<8x32xf32>
    %51 = arith.addf %49, %50 : vector<8x32xf32>
    %cst_24 = arith.constant 0.000000e+00 : f32
    %52 = vector.broadcast %cst_24 : f32 to vector<8x32xf32>
    %53 = arith.maximumf %51, %52 : vector<8x32xf32>
    %54 = arith.truncf %53 : vector<8x32xf32> to vector<8x32xbf16>
    %c0_25 = arith.constant 0 : index
    %c0_26 = arith.constant 0 : index
    %55 = vector.load %arg6[%c0_25, %c0_26] : memref<32x32xbf16, #tpu.memory_space<vmem>>, vector<32x32xbf16>
    %cst_27 = arith.constant dense<0.000000e+00> : vector<8x32xf32>
    %56 = tpu.matmul %54, %55, %cst_27 {dimension_numbers = #tpu.dot_dimension_numbers<[1], [0], [0], [1], [0, 0, 1, 1], [], []>} : vector<8x32xbf16>, vector<32x32xbf16>, vector<8x32xf32> -> vector<8x32xf32>
    %c0_28 = arith.constant 0 : index
    %c0_29 = arith.constant 0 : index
    %57 = vector.load %arg7[%c0_28, %c0_29] : memref<1x32xf32, #tpu.memory_space<vmem>>, vector<1x32xf32>
    %58 = vector.broadcast %57 : vector<1x32xf32> to vector<8x32xf32>
    %59 = arith.addf %56, %58 : vector<8x32xf32>
    %c0_30 = arith.constant 0 : index
    %c0_31 = arith.constant 0 : index
    %60 = vector.load %arg12[%c0_30, %c0_31] : memref<1x32xf32, #tpu.memory_space<vmem>>, vector<1x32xf32>
    %c0_32 = arith.constant 0 : index
    %c0_33 = arith.constant 0 : index
    %61 = vector.load %arg13[%c0_32, %c0_33] : memref<1x32xf32, #tpu.memory_space<vmem>>, vector<1x32xf32>
    %cst_34 = arith.constant dense<0.000000e+00> : vector<8xf32>
    %62 = vector.multi_reduction <add>, %59, %cst_34 [1] : vector<8x32xf32> to vector<8xf32>
    %63 = vector.shape_cast %62 : vector<8xf32> to vector<8x1xf32>
    %cst_35 = arith.constant 3.200000e+01 : f32
    %64 = vector.broadcast %cst_35 : f32 to vector<8x1xf32>
    %65 = arith.divf %63, %64 : vector<8x1xf32>
    %66 = vector.broadcast %65 : vector<8x1xf32> to vector<8x32xf32>
    %67 = arith.subf %59, %66 : vector<8x32xf32>
    %68 = arith.mulf %67, %67 : vector<8x32xf32>
    %cst_36 = arith.constant dense<0.000000e+00> : vector<8xf32>
    %69 = vector.multi_reduction <add>, %68, %cst_36 [1] : vector<8x32xf32> to vector<8xf32>
    %70 = vector.shape_cast %69 : vector<8xf32> to vector<8x1xf32>
    %cst_37 = arith.constant 3.200000e+01 : f32
    %71 = vector.broadcast %cst_37 : f32 to vector<8x1xf32>
    %72 = arith.divf %70, %71 : vector<8x1xf32>
    %cst_38 = arith.constant 9.99999974E-6 : f32
    %73 = vector.broadcast %cst_38 : f32 to vector<8x1xf32>
    %74 = arith.addf %72, %73 : vector<8x1xf32>
    %75 = math.rsqrt %74 : vector<8x1xf32>
    %76 = vector.broadcast %75 : vector<8x1xf32> to vector<8x32xf32>
    %77 = arith.mulf %67, %76 : vector<8x32xf32>
    %78 = vector.broadcast %60 : vector<1x32xf32> to vector<8x32xf32>
    %79 = arith.mulf %77, %78 : vector<8x32xf32>
    %80 = vector.broadcast %61 : vector<1x32xf32> to vector<8x32xf32>
    %81 = arith.addf %79, %80 : vector<8x32xf32>
    %cst_39 = arith.constant 0.000000e+00 : f32
    %82 = vector.broadcast %cst_39 : f32 to vector<8x32xf32>
    %83 = arith.maximumf %81, %82 : vector<8x32xf32>
    %84 = arith.truncf %83 : vector<8x32xf32> to vector<8x32xbf16>
    %c0_40 = arith.constant 0 : index
    %c0_41 = arith.constant 0 : index
    %85 = vector.load %arg8[%c0_40, %c0_41] : memref<32x128xbf16, #tpu.memory_space<vmem>>, vector<32x128xbf16>
    %cst_42 = arith.constant dense<0.000000e+00> : vector<8x128xf32>
    %86 = tpu.matmul %84, %85, %cst_42 {dimension_numbers = #tpu.dot_dimension_numbers<[1], [0], [0], [1], [0, 0, 1, 1], [], []>} : vector<8x32xbf16>, vector<32x128xbf16>, vector<8x128xf32> -> vector<8x128xf32>
    %c0_43 = arith.constant 0 : index
    %c0_44 = arith.constant 0 : index
    %87 = vector.load %arg9[%c0_43, %c0_44] : memref<1x128xf32, #tpu.memory_space<vmem>>, vector<1x128xf32>
    %88 = vector.broadcast %87 : vector<1x128xf32> to vector<8x128xf32>
    %89 = arith.addf %86, %88 : vector<8x128xf32>
    %90 = math.tanh %89 : vector<8x128xf32>
    %c0_45 = arith.constant 0 : index
    %c0_46 = arith.constant 0 : index
    %91 = vector.load %arg14[%c0_45, %c0_46] : memref<8x128xf32, #tpu.memory_space<vmem>>, vector<8x128xf32>
    tpu.vector_store %arg14[%c0_45, %c0_46], %90 {strides = array<i32>} : memref<8x128xf32, #tpu.memory_space<vmem>>, vector<8x128xf32>,
    return
  }
  func.func @transform_0(%arg0: i32) -> (i32, i32) {
    %c0_i32 = arith.constant 0 : i32
    %c0_i32_0 = arith.constant 0 : i32
    return %arg0, %c0_i32 : i32, i32
  }
  func.func @transform_1(%arg0: i32) -> (i32, i32) {
    %c0_i32 = arith.constant 0 : i32
    %c0_i32_0 = arith.constant 0 : i32
    return %arg0, %c0_i32 : i32, i32
  }
  func.func @transform_2(%arg0: i32) -> (i32, i32) {
    %c0_i32 = arith.constant 0 : i32
    %c0_i32_0 = arith.constant 0 : i32
    %c0_i32_1 = arith.constant 0 : i32
    return %c0_i32, %c0_i32_0 : i32, i32
  }
  func.func @transform_3(%arg0: i32) -> (i32, i32) {
    %c0_i32 = arith.constant 0 : i32
    %c0_i32_0 = arith.constant 0 : i32
    %c0_i32_1 = arith.constant 0 : i32
    return %c0_i32, %c0_i32_0 : i32, i32
  }
  func.func @transform_4(%arg0: i32) -> (i32, i32) {
    %c0_i32 = arith.constant 0 : i32
    %c0_i32_0 = arith.constant 0 : i32
    %c0_i32_1 = arith.constant 0 : i32
    return %c0_i32, %c0_i32_0 : i32, i32
  }
  func.func @transform_5(%arg0: i32) -> (i32, i32) {
    %c0_i32 = arith.constant 0 : i32
    %c0_i32_0 = arith.constant 0 : i32
    %c0_i32_1 = arith.constant 0 : i32
    return %c0_i32, %c0_i32_0 : i32, i32
  }
  func.func @transform_6(%arg0: i32) -> (i32, i32) {
    %c0_i32 = arith.constant 0 : i32
    %c0_i32_0 = arith.constant 0 : i32
    %c0_i32_1 = arith.constant 0 : i32
    return %c0_i32, %c0_i32_0 : i32, i32
  }
  func.func @transform_7(%arg0: i32) -> (i32, i32) {
    %c0_i32 = arith.constant 0 : i32
    %c0_i32_0 = arith.constant 0 : i32
    %c0_i32_1 = arith.constant 0 : i32
    return %c0_i32, %c0_i32_0 : i32, i32
  }
  func.func @transform_8(%arg0: i32) -> (i32, i32) {
    %c0_i32 = arith.constant 0 : i32
    %c0_i32_0 = arith.constant 0 : i32
    %c0_i32_1 = arith.constant 0 : i32
    return %c0_i32, %c0_i32_0 : i32, i32
  }
  func.func @transform_9(%arg0: i32) -> (i32, i32) {
    %c0_i32 = arith.constant 0 : i32
    %c0_i32_0 = arith.constant 0 : i32
    %c0_i32_1 = arith.constant 0 : i32
    return %c0_i32, %c0_i32_0 : i32, i32
  }
  func.func @transform_10(%arg0: i32) -> (i32, i32) {
    %c0_i32 = arith.constant 0 : i32
    %c0_i32_0 = arith.constant 0 : i32
    %c0_i32_1 = arith.constant 0 : i32
    return %c0_i32, %c0_i32_0 : i32, i32
  }
  func.func @transform_11(%arg0: i32) -> (i32, i32) {
    %c0_i32 = arith.constant 0 : i32
    %c0_i32_0 = arith.constant 0 : i32
    %c0_i32_1 = arith.constant 0 : i32
    return %c0_i32, %c0_i32_0 : i32, i32
  }
  func.func @transform_12(%arg0: i32) -> (i32, i32) {
    %c0_i32 = arith.constant 0 : i32
    %c0_i32_0 = arith.constant 0 : i32
    %c0_i32_1 = arith.constant 0 : i32
    return %c0_i32, %c0_i32_0 : i32, i32
  }
  func.func @transform_13(%arg0: i32) -> (i32, i32) {
    %c0_i32 = arith.constant 0 : i32
    %c0_i32_0 = arith.constant 0 : i32
    return %arg0, %c0_i32 : i32, i32
  }
  func.func @transform_14(%arg0: i32) -> (i32, i32) {
    %c0_i32 = arith.constant 0 : i32
    %c0_i32_0 = arith.constant 0 : i32
    return %arg0, %c0_i32 : i32, i32
  }
}

</mosaic_0001>

<bundles_post_ra>
// kernel: tpu_custom_call.1
= control target key start
LH: loop header
LB: loop body
LE: loop exit
PB: predicated region body
PF: predicated region fallthrough
CT: control target
= control target key end

     0   :  { %20 = vsyncpa [#allocation3], 0  ;;  %s884_s0 = inlined_call_operand.hbm [shape: bf16[8,16], index: 0, kind: input, shape index: {}]   ;;  %s885_s1 = inlined_call_operand.hbm [shape: f32[8,128], index: 1, kind: input, shape index: {}]   ;;  %s886_s2 = inlined_call_operand.hbm [shape: s32[1,32], index: 2, kind: input, shape index: {}]   ;;  %s887_s3 = inlined_call_operand.hbm [shape: bf16[16,160], index: 3, kind: input, shape index: {}]   ;;  %s888_s4 = inlined_call_operand.vmem [shape: f32[1,160], index: 4, kind: input, shape index: {}]   ;;  %s889_s5 = inlined_call_operand.vmem [shape: bf16[32,32], index: 5, kind: input, shape index: {}]   ;;  %s890_s6 = inlined_call_operand.vmem [shape: f32[1,32], index: 6, kind: input, shape index: {}]   ;;  %s891_s7 = inlined_call_operand.hbm [shape: bf16[32,128], index: 7, kind: input, shape index: {}]   ;;  %s892_s8 = inlined_call_operand.vmem [shape: f32[1,128], index: 8, kind: input, shape index: {}]   ;;  %s893_s9 = inlined_call_operand.vmem [shape: f32[1,32], index: 9, kind: input, shape index: {}]   ;;  %s894_s10 = inlined_call_operand.vmem [shape: f32[1,32], index: 10, kind: input, shape index: {}]   ;;  %s895_s11 = inlined_call_operand.vmem [shape: f32[1,32], index: 11, kind: input, shape index: {}]   ;;  %s896_s12 = inlined_call_operand.vmem [shape: f32[1,32], index: 12, kind: input, shape index: {}]   ;;  %s897_s13 = inlined_call_operand.hbm [shape: f32[8,128], index: 13, kind: output, shape index: {0}]   ;;  %s898_s14 = inlined_call_operand.hbm [shape: f32[8,128], index: 14, kind: output, shape index: {1}]  }
   0x1   :  { %21 = vsyncpa [#allocation6], 0 }
   0x2   :  { %22 = vsyncpa [#allocation9], 0 }
   0x3   :  { %23 = vsyncpa [#allocation4], 0 }
   0x4   :  { %24 = vsyncpa [#allocation13], 0  ;;  %s671_s29 = smov [#allocation5]   ;;  %s672_s15 = smov [#allocation8]  }
   0x5   :  { %s41_s30 = sshll.u32 %s671_s29, 4  ;;  %s60_s16 = sshll.u32 %s672_s15, 4  ;;  %s42_s30 = int_to_ptr.vmem [resolvable:$true] %s41_s30  ;;  %s760_s16 = int_to_ptr.vmem [resolvable:$true] %s60_s16 }
   0x6   :  { %s507_s19 = scalar_lea.hbm %s885_s1, 128 }
   0x7   :  { %p508_p0 = scmp.ne.s32.totalorder %s885_s1, %s507_s19  ;;  %p511_p1 = scmp.lt.u32.totalorder %s507_s19, %s885_s1 }
   0x9   :  { %p513_p2 = pnand %p511_p1, %p508_p0 }
   0xb   :  { %516 = shalt.err (!%p513_p2)
}
   0xc   :  { %s517_s24 = scalar_lea.vmem %s42_s30, 128  ;;  %p522_p4 = scmp.lt.s32.totalorder %s42_s30, %s42_s30 }
   0xd   :  { %p518_p3 = scmp.ne.s32.totalorder %s42_s30, %s517_s24  ;;  %p523_p5 = scmp.lt.s32.totalorder %s517_s24, %s517_s24 }
   0xf   :  { %p524_p6 = por %p523_p5, %p522_p4 }
  0x11   :  { %p525_p7 = pnand %p524_p6, %p518_p3 }
  0x13   :  { %528 = shalt.err (!%p525_p7)
}
  0x14   :  { %44 = dma.hbm_to_vmem [thread:$0]  %s885_s1, 128, %s42_s30, [#allocation6]  }
  0x15   :  { %s529_s29 = scalar_lea.hbm %s887_s3, 256 }
  0x16   :  { %p530_p8 = scmp.ne.s32.totalorder %s887_s3, %s529_s29  ;;  %p533_p9 = scmp.lt.u32.totalorder %s529_s29, %s887_s3 }
  0x18   :  { %p535_p10 = pnand %p533_p9, %p530_p8 }
  0x1a   :  { %538 = shalt.err (!%p535_p10)
}
  0x1b   :  { %s539_s20 = scalar_lea.vmem %s760_s16, 256  ;;  %p544_p12 = scmp.lt.s32.totalorder %s760_s16, %s760_s16 }
  0x1c   :  { %p540_p11 = scmp.ne.s32.totalorder %s760_s16, %s539_s20  ;;  %p545_p13 = scmp.lt.s32.totalorder %s539_s20, %s539_s20 }
  0x1e   :  { %p546_p0 = por %p545_p13, %p544_p12 }
  0x20   :  { %p547_p1 = pnand %p546_p0, %p540_p11 }
  0x22   :  { %550 = shalt.err (!%p547_p1)
}
  0x23   :  { %s673_s1 = smov 128   ;;  %s674_s30 = smov 8  }
  0x24   :  { %66 = dma.hbm_to_vmem [thread:$0]  %s887_s3, 256, %s760_s16, [#allocation9], %s673_s1, %s673_s1, %s674_s30  }
  0x25   :  { %s675_s23 = smov [#allocation2]   ;;  %s676_s25 = smov [#allocation7]  }
  0x26   :  { %s31_s24 = sshll.u32 %s675_s23, 4  ;;  %s51_s26 = sshll.u32 %s676_s25, 4  ;;  %s32_s24 = int_to_ptr.vmem [resolvable:$true] %s31_s24  ;;  %s52_s26 = int_to_ptr.vmem [resolvable:$true] %s51_s26 }
  0x27   :  { %s551_s29 = scalar_lea.hbm %s884_s0, 64 }
  0x28   :  { %p552_p2 = scmp.ne.s32.totalorder %s884_s0, %s551_s29  ;;  %p555_p3 = scmp.lt.u32.totalorder %s551_s29, %s884_s0 }
  0x2a   :  { %p557_p4 = pnand %p555_p3, %p552_p2 }
  0x2c   :  { %560 = shalt.err (!%p557_p4)
}
  0x2d   :  { %s561_s3 = scalar_lea.vmem %s32_s24, 64  ;;  %p566_p6 = scmp.lt.s32.totalorder %s32_s24, %s32_s24 }
  0x2e   :  { %p562_p5 = scmp.ne.s32.totalorder %s32_s24, %s561_s3  ;;  %p567_p7 = scmp.lt.s32.totalorder %s561_s3, %s561_s3 }
  0x30   :  { %p568_p8 = por %p567_p7, %p566_p6 }
  0x32   :  { %p569_p9 = pnand %p568_p8, %p562_p5 }
  0x34   :  { %572 = shalt.err (!%p569_p9)
}
  0x35   :  { %34 = dma.hbm_to_vmem [thread:$0]  %s884_s0, 64, %s32_s24, [#allocation3]  }
  0x36   :  { %s573_s21 = scalar_lea.hbm %s886_s2, 16 }
  0x37   :  { %p574_p10 = scmp.ne.s32.totalorder %s886_s2, %s573_s21  ;;  %p577_p11 = scmp.lt.u32.totalorder %s573_s21, %s886_s2 }
  0x39   :  { %p579_p12 = pnand %p577_p11, %p574_p10 }
  0x3b   :  { %582 = shalt.err (!%p579_p12)
}
  0x3c   :  { %s583_s28 = scalar_lea.vmem %s52_s26, 16  ;;  %s587_s29 = scalar_lea.vmem %s52_s26, 32 }
  0x3d   :  { %p584_p13 = scmp.ne.s32.totalorder %s52_s26, %s583_s28  ;;  %p588_p0 = scmp.lt.s32.totalorder %s52_s26, %s52_s26 }
  0x3e   :  { %p589_p1 = scmp.lt.s32.totalorder %s587_s29, %s583_s28 }
  0x40   :  { %p590_p2 = por %p589_p1, %p588_p0 }
  0x42   :  { %p591_p3 = pnand %p590_p2, %p584_p13 }
  0x44   :  { %594 = shalt.err (!%p591_p3)
}
  0x45   :  { %54 = dma.hbm_to_vmem [thread:$0]  %s886_s2, 16, %s52_s26, [#allocation6]  }
  0x46   :  { %s677_s15 = smov [#allocation10]   ;;  %s595_s3 = scalar_lea.hbm %s891_s7, 256 }
  0x47   :  { %s78_s17 = sshll.u32 %s677_s15, 4  ;;  %p596_p4 = scmp.ne.s32.totalorder %s891_s7, %s595_s3  ;;  %s79_s17 = int_to_ptr.vmem [resolvable:$true] %s78_s17 }
  0x48   :  { %p599_p5 = scmp.lt.u32.totalorder %s595_s3, %s891_s7 }
  0x4a   :  { %p601_p6 = pnand %p599_p5, %p596_p4 }
  0x4c   :  { %604 = shalt.err (!%p601_p6)
}
  0x4d   :  { %s605_s21 = scalar_lea.vmem %s79_s17, 256  ;;  %p610_p8 = scmp.lt.s32.totalorder %s79_s17, %s79_s17 }
  0x4e   :  { %p606_p7 = scmp.ne.s32.totalorder %s79_s17, %s605_s21  ;;  %p611_p9 = scmp.lt.s32.totalorder %s605_s21, %s605_s21 }
  0x50   :  { %p612_p10 = por %p611_p9, %p610_p8 }
  0x52   :  { %p613_p11 = pnand %p612_p10, %p606_p7 }
  0x54   :  { %616 = shalt.err (!%p613_p11)
}
  0x55   :  { %s678_s2 = smov 64   ;;  %s679_s26 = smov 4  }
  0x56   :  { %84 = dma.hbm_to_vmem [thread:$0]  %s891_s7, 256, %s79_s17, [#allocation9], %s678_s2, %s678_s2, %s679_s26  }
  0x57   :  { %661 = dma.done.wait [#allocation3], 64  }
  0x58   :  { %662 = vsyncadd [#allocation3], 4294967232 }
  0x59   :  { %663 = dma.done.wait [#allocation6], 144  }
  0x5a   :  { %664 = vsyncadd [#allocation6], 4294967152 }
  0x5b   :  { %665 = dma.done.wait [#allocation9], 512  }
  0x5c   :  { %666 = vsyncadd [#allocation9], 4294966784  ;;  %v680_v0 = vmov 0   ;;  %v494_v1 = vld [vmem:[#allocation8 + $0x4] ss:$8 sps:$4 sm:$0xff]   ;;  %vm136_vm0 = vcmask 130048   ;;  %v116_v4 = vlaneseq }
  0x5d   :  { %172 = vmatprep.mubr.bf16.mxu0 %v680_v0  ;;  %v496_v2 = vld [vmem:[#allocation8] ss:$8 sps:$4 sm:$0xff]   ;;  %v111_v3 = vld [vmem:[#allocation2] sm:$0xf]  ;;  %140 = vmatprep.subr.bf16.mxu0 %v494_v1  ;;  %v182_v11 = vld [vmem:[#allocation5] sm:$0xff]  ;;  %vm215_vm4 = vcmask 261120  }
  0x5e   :  { %141 = vmatpush1.bf16.msra.mxu0 %v496_v2  ;;  %v117_v5 = vshrl.u32 %v116_v4, 7  ;;  %v114_v7 = vld [vmem:[%s888_s4] sm:$0x3]  ;;  %v185_v9 = vand.u32 127, %v116_v4  ;;  %v445_v32 = vld [vmem:[#allocation7] ss:$0 sm:$0xff] }
  0x5f   :  { %v497_v42 = vld [vmem:[%s889_s5] sm:$0xff]   ;;  %v681_v43 = vmov 0.0   ;;  %vm682_vm6 = vmmov 0   ;;  %v498_v44 = vld [vmem:[%s889_s5 + $0x8] sm:$0xff]   ;;  %s683_s3 = smov [#allocation12]  }
  0x60   :  { %v118_v6 = vsub.s32 0, %v117_v5  ;;  %vm186_vm1 = vcmp.lt.s32.totalorder %v185_v9, 8  ;;  %v122_v26 = vsub.s32 1, %v117_v5  ;;  %464 = vmatprep.subr.bf16.mxu1 %v681_v43  ;;  %468 = vmatprep.mubr.msk.bf16.mxu1 %vm682_vm6, %v681_v43  ;;  %v446_v49 = vld [vmem:[%s893_s9] ss:$0 sm:$0xff]  ;;  %v499_v4 = vld [vmem:[#allocation10] sm:$0xff]  }
  0x61   :  { %444 = vmatmul.mubr.msk.bf16.vlgmr.msra.gmra.mrb[0].mxu0 %vm136_vm0, %v111_v3  ;;  %465 = vmatpush3.bf16.msra.mxu1 %v497_v42  ;;  %v447_v51 = vld [vmem:[%s894_s10] ss:$0 sm:$0xff]  ;;  %v500_v5 = vld [vmem:[#allocation10 + $0x8] sm:$0xff]   ;;  %s427_s16 = sshll.u32 %s683_s3, 4  ;;  %s428_s16 = int_to_ptr.vmem [resolvable:$true] %s427_s16 }
  0x62   :  { %v119_v8 = vrot.slane %v114_v7, %v118_v6  ;;  %v123_v28 = vrot.slane %v114_v7, %v122_v26  ;;  %472 = vmatprep.subr.bf16.mxu0 %v681_v43  ;;  %466 = vmatprep.subr.bf16.mxu1 %v681_v43  ;;  %v448_v56 = vld [vmem:[%s890_s6] ss:$0 sm:$0xff]  ;;  %s617_s20 = scalar_lea.vmem %s428_s16, 128  ;;  %p622_p13 = scmp.lt.s32.totalorder %s428_s16, %s428_s16 }
  0x63   :  { %476 = vmatprep.mubr.msk.bf16.mxu0 %vm682_vm6, %v681_v43  ;;  %473 = vmatpush3.bf16.msra.mxu0 %v499_v4  ;;  %p618_p12 = scmp.ne.s32.totalorder %s428_s16, %s617_s20  ;;  %p623_p0 = scmp.lt.s32.totalorder %s617_s20, %s617_s20 }
  0x64   :  { %474 = vmatprep.subr.bf16.mxu0 %v681_v43 }
  0x65   :  { %467 = vmatpush3.bf16.msra.mxu1 %v498_v44  ;;  %p624_p1 = por %p623_p0, %p622_p13 }
  0x67   :  { %475 = vmatpush3.bf16.msra.mxu0 %v500_v5  ;;  %p625_p2 = pnand %p624_p1, %p618_p12 }
 0x134   :  { %v174_v10 = vpop.f32.mrb[0].mxu0 }
 0x135   :  { %v175_v12 = vadd.f32 %v174_v10, %v119_v8  ;;  %v176_v13 = vpop.f32.mrb[1].mxu0  ;;  %v452_v10 = vld [vmem:[%s895_s11] ss:$0 sm:$0xff] }
 0x136   :  { %v178_v14 = vpop.f32.mrb[2].mxu0  ;;  %v177_v34 = vadd.f32 %v176_v13, %v123_v28 }
 0x137   :  { %181 = vst [vmem:[#allocation12] sm:$0xff] %v175_v12  ;;  %v179_v15 = vpop.f32.mrb[3].mxu0  ;;  %v183_v16 = vadd.f32 %v182_v11, %v175_v12  ;;  %v453_v12 = vld [vmem:[%s896_s12] ss:$0 sm:$0xff] }
 0x139   :  { %v187_v17 = vsel %vm186_vm1, %v183_v16, -inf }
 0x13a   :  { %188 = vmax.xlane.f32.xlu0 %v187_v17 }
 0x1c7   :  { %v189_v18 = vpop.xlane.xlu0 %188 }
 0x1c8   :  { %vm190_vm2 = vcmp.eq.f32.partialorder %v187_v17, %v189_v18 }
 0x1c9   :  { %v191_v19 = vsel %vm190_vm2, %v185_v9, 128 }
 0x1ca   :  { %v193_v20 = vshra.s32 %v191_v19, 16  ;;  %v192_v22 = vand.u32 65535, %v191_v19 }
 0x1cc   :  { %v195_v21 = vcvt.s32.f32 %v193_v20  ;;  %v194_v24 = vcvt.s32.f32 %v192_v22 }
 0x1ce   :  { %196 = vmin.xlane.f32.xlu0 %v195_v21 }
 0x25b   :  { %v197_v23 = vpop.xlane.xlu0 %196 }
 0x25c   :  { %vm198_vm3 = vcmp.eq.f32.partialorder %v195_v21, %v197_v23  ;;  %v203_v27 = vcvt.f32.s32 %v197_v23 }
 0x25d   :  { %v199_v25 = vsel %vm198_vm3, %v194_v24, inf }
 0x25e   :  { %200 = vmin.xlane.f32.xlu1 %v199_v25  ;;  %v204_v30 = vshll.u32 %v203_v27, 16 }
 0x2eb   :  { %v201_v29 = vpop.xlane.xlu1 %200 }
 0x2ec   :  { %v202_v31 = vcvt.f32.s32 %v201_v29 }
 0x2ee   :  { %v205_v33 = vadd.s32 %v204_v30, %v202_v31 }
 0x2f0   :  { %vm211_vm5 = vcmp.eq.s32.totalorder %v445_v32, %v205_v33 }
 0x2f1   :  { %v212_v35 = vsel %vm211_vm5, %v177_v34, 0.0 }
 0x2f2   :  { %v216_v36 = vsel %vm215_vm4, %v212_v35, 0.0 }
 0x2f3   :  { %217 = vadd.xlane.f32.xlu1 %v216_v36 }
 0x380   :  { %v218_v37 = vpop.xlane.xlu1 %217 }
 0x381   :  { %v220_v38 = vmul.f32 0.03125, %v218_v37 }
 0x383   :  { %v221_v39 = vsub.f32 %v212_v35, %v220_v38 }
 0x385   :  { %v222_v40 = vmul.f32 %v221_v39, %v221_v39 }
 0x387   :  { %v223_v41 = vsel %vm215_vm4, %v222_v40, 0.0 }
 0x388   :  { %224 = vadd.xlane.f32.xlu0 %v223_v41 }
 0x415   :  { %v225_v45 = vpop.xlane.xlu0 %224 }
 0x416   :  { %v226_v46 = vmul.f32 0.03125, %v225_v45 }
 0x418   :  { %v227_v47 = vadd.f32 1e-05, %v226_v46 }
 0x41a   :  { %501 = vrsqrt.f32 %v227_v47 }
 0x424   :  { %v502_v48 = vpop.eup %501 }
 0x425   :  { %v229_v50 = vmul.f32 %v502_v48, %v221_v39 }
 0x427   :  { %v236_v52 = vmul.f32 %v446_v49, %v229_v50 }
 0x429   :  { %v243_v53 = vadd.f32 %v447_v51, %v236_v52 }
 0x42b   :  { %v244_v54 = vmax.f32 %v243_v53, 0.0 }
 0x42d   :  { %v245_v55 = vpack.c.bf16 %v244_v54, %v244_v54 }
 0x42f   :  { %469 = vmatmul.mubr.msk.bf16.vlgmr.msra.gmra.mrb[0].mxu1 %vm215_vm4, %v245_v55 }
 0x502   :  { %v306_v57 = vpop.f32.mrb[0].mxu1 }
 0x503   :  { %v307_v58 = vadd.f32 %v448_v56, %v306_v57  ;;  %v470_v59 = vpop.f32.mrb[1].mxu1 }
 0x504   :  { %v309_v60 = vpop.f32.mrb[2].mxu1 }
 0x505   :  { %v471_v61 = vpop.f32.mrb[3].mxu1  ;;  %v314_v62 = vsel %vm215_vm4, %v307_v58, 0.0 }
 0x506   :  { %315 = vadd.xlane.f32.xlu1 %v314_v62 }
 0x593   :  { %v316_v63 = vpop.xlane.xlu1 %315 }
 0x594   :  { %v317_v0 = vmul.f32 0.03125, %v316_v63 }
 0x596   :  { %v318_v1 = vsub.f32 %v307_v58, %v317_v0 }
 0x598   :  { %v319_v2 = vmul.f32 %v318_v1, %v318_v1 }
 0x59a   :  { %v320_v3 = vsel %vm215_vm4, %v319_v2, 0.0 }
 0x59b   :  { %321 = vadd.xlane.f32.xlu0 %v320_v3 }
 0x628   :  { %v322_v6 = vpop.xlane.xlu0 %321 }
 0x629   :  { %v323_v7 = vmul.f32 0.03125, %v322_v6 }
 0x62b   :  { %v324_v8 = vadd.f32 1e-05, %v323_v7 }
 0x62d   :  { %503 = vrsqrt.f32 %v324_v8 }
 0x637   :  { %v504_v9 = vpop.eup %503 }
 0x638   :  { %v326_v11 = vmul.f32 %v504_v9, %v318_v1 }
 0x63a   :  { %v333_v13 = vmul.f32 %v452_v10, %v326_v11 }
 0x63c   :  { %v340_v14 = vadd.f32 %v453_v12, %v333_v13 }
 0x63e   :  { %v341_v15 = vmax.f32 %v340_v14, 0.0 }
 0x640   :  { %v342_v16 = vpack.c.bf16 %v341_v15, %v341_v15 }
 0x642   :  { %477 = vmatmul.mubr.msk.bf16.vlgmr.msra.gmra.mrb[4].mxu0 %vm215_vm4, %v342_v16 }
 0x643   :  { %628 = shalt.err (!%p625_p2)
}
 0x644   :  { %s629_s12 = scalar_lea.hbm %s898_s14, 128 }
 0x645   :  { %p630_p3 = scmp.ne.s32.totalorder %s898_s14, %s629_s12  ;;  %p633_p4 = scmp.lt.u32.totalorder %s629_s12, %s898_s14 }
 0x647   :  { %p635_p5 = pnand %p633_p4, %p630_p3 }
 0x649   :  { %638 = shalt.err (!%p635_p5)
}
 0x64a   :  { %430 = dma.vmem_to_hbm [thread:$0]  %s428_s16, 128, %s898_s14, [#allocation13]   ;;  %v454_v17 = vld [vmem:[%s892_s8] ss:$0 sm:$0xff] }
 0x64b   :  { %s684_s4 = smov [#allocation11]  }
 0x64c   :  { %s417_s27 = sshll.u32 %s684_s4, 4  ;;  %s418_s27 = int_to_ptr.vmem [resolvable:$true] %s417_s27 }
 0x64d   :  { %s639_s28 = scalar_lea.vmem %s418_s27, 128  ;;  %p644_p7 = scmp.lt.s32.totalorder %s418_s27, %s418_s27 }
 0x64e   :  { %p640_p6 = scmp.ne.s32.totalorder %s418_s27, %s639_s28  ;;  %p645_p8 = scmp.lt.s32.totalorder %s639_s28, %s639_s28 }
 0x650   :  { %p646_p9 = por %p645_p8, %p644_p7 }
 0x652   :  { %p647_p10 = pnand %p646_p9, %p640_p6 }
 0x715   :  { %v403_v18 = vpop.f32.mrb[4].mxu0 }
 0x716   :  { %v404_v19 = vadd.f32 %v454_v17, %v403_v18  ;;  %v478_v20 = vpop.f32.mrb[5].mxu0 }
 0x717   :  { %v406_v21 = vpop.f32.mrb[6].mxu0 }
 0x718   :  { %505 = vtanh.f32 %v404_v19  ;;  %v479_v22 = vpop.f32.mrb[7].mxu0 }
 0x722   :  { %v506_v23 = vpop.eup %505 }
 0x723   :  { %410 = vst [vmem:[#allocation11] sm:$0xff] %v506_v23 }
 0x724   :  { %650 = shalt.err (!%p647_p10)
}
 0x725   :  { %s651_s29 = scalar_lea.hbm %s897_s13, 128 }
 0x726   :  { %p652_p11 = scmp.ne.s32.totalorder %s897_s13, %s651_s29  ;;  %p655_p12 = scmp.lt.u32.totalorder %s651_s29, %s897_s13 }
 0x728   :  { %p657_p13 = pnand %p655_p12, %p652_p11 }
 0x72a   :  { %660 = shalt.err (!%p657_p13)
}
 0x72b   :  { %420 = dma.vmem_to_hbm [thread:$0]  %s418_s27, 128, %s897_s13, [#allocation4]  }
 0x72c   :  { %667 = dma.done.wait [#allocation4], 128  }
 0x72d   :  { %668 = vsyncadd [#allocation4], 4294967168 }
 0x72e   :  { %669 = dma.done.wait [#allocation13], 128  }
 0x72f   :  { %670 = vsyncadd [#allocation13], 4294967168 }
 0x730   :  { %437 = vsyncpa [#allocation3], 1 }
 0x731   :  { %438 = vsyncpa [#allocation6], 1 }
 0x732   :  { %439 = vsyncpa [#allocation9], 1 }
 0x733   :  { %440 = vsyncpa [#allocation4], 1 }
 0x734   :  { %441 = vsyncpa [#allocation13], 1 }

</bundles_post_ra>
